<compile_context>
chip_gen: v5e
topology: v5e:2x2
jax: 0.10.0
libtpu: 0.0.40
codegen_flags: <defaults>
</compile_context>

<pallas_src>
import functools
import numpy as np
import jax
import jax.numpy as jnp
from jax.experimental import pallas as pl
from jax.experimental.pallas import tpu as pltpu


# ----------------------------------------------------------------------------------
# Pallas fused matmul + bias + activation (+ residual) kernels (the compute hot path)
# ----------------------------------------------------------------------------------
def _round_up(x, m):
    return (x + m - 1) // m * m


def _apply_act(r, act, slope):
    if act == "leaky_relu":
        return jnp.where(r >= 0, r, slope * r)
    if act == "tanh":
        return jnp.tanh(r)
    if act == "sigmoid":
        return jax.nn.sigmoid(r)
    return r


def _mm_kernel(a_ref, b_ref, bias_ref, o_ref, *, act, slope, n_off):
    # Single full-K reduction step: no accumulator scratch, no init/finalize overhead.
    r = jnp.dot(a_ref[...], b_ref[...], preferred_element_type=jnp.float32)
    r = r + bias_ref[...]
    if act == "deform_head":
        # Fused deformable-alignment head: columns < n_off are offsets (scaled tanh),
        # the rest are the modulation mask (sigmoid). One GEMM instead of two.
        tn = r.shape[1]
        col = jax.lax.broadcasted_iota(jnp.int32, r.shape, 1) + pl.program_id(1) * tn
        r = jnp.where(col < n_off, slope * jnp.tanh(r), jax.nn.sigmoid(r))
    else:
        r = _apply_act(r, act, slope)
    o_ref[...] = r.astype(o_ref.dtype)


def _mm_res_kernel(a_ref, b_ref, bias_ref, res_ref, o_ref, *, act, slope):
    # Full-K GEMM with the residual add fused in the epilogue (free VPU slots).
    r = jnp.dot(a_ref[...], b_ref[...], preferred_element_type=jnp.float32)
    r = r + bias_ref[...]
    r = _apply_act(r, act, slope) + res_ref[...].astype(jnp.float32)
    o_ref[...] = r.astype(o_ref.dtype)


def _mm_ksplit_kernel(a_ref, b_ref, bias_ref, o_ref, acc_ref, *, act, slope):
    # Fallback for very large K (not hit at this model's shapes).
    @pl.when(pl.program_id(2) == 0)
    def _():
        acc_ref[...] = jnp.zeros_like(acc_ref)

    acc_ref[...] += jnp.dot(a_ref[...], b_ref[...], preferred_element_type=jnp.float32)

    @pl.when(pl.program_id(2) == pl.num_programs(2) - 1)
    def _():
        r = acc_ref[...] + bias_ref[...]
        o_ref[...] = _apply_act(r, act, slope).astype(o_ref.dtype)


def _gmm_kernel(a_ref, b_ref, bias_ref, o_ref, *, act, slope):
    # Grouped (per-group full-K) GEMM body; grid carries the group axis.
    r = jnp.dot(a_ref[...], b_ref[...], preferred_element_type=jnp.float32)
    r = r + bias_ref[...]
    o_ref[...] = _apply_act(r, act, slope).astype(o_ref.dtype)


@functools.partial(jax.jit,
                   static_argnames=("act", "slope", "n_off", "tm", "tn", "tk", "out_dtype"))
def _mm_call(a_p, b_p, bias_p, res_p, act, slope, n_off, tm, tn, tk, out_dtype):
    Mp, Kp = a_p.shape
    _, Np = b_p.shape
    nm, nn, nk = Mp // tm, Np // tn, Kp // tk

    out_bytes = jnp.dtype(out_dtype).itemsize
    footprint = 2 * (2 * tm * tk + 2 * tk * tn + 4 * tn + out_bytes * tm * tn)
    if res_p is not None:
        footprint += 2 * 2 * tm * tn
    # Per-call VMEM limit computed from the actual double-buffered working set (v7x: 64 MiB/TC).
    vmem_limit = int(min(max(2 * footprint, 16 << 20), 48 << 20))

    if nk == 1:
        if res_p is None:
            kernel = functools.partial(_mm_kernel, act=act, slope=slope, n_off=n_off)
            in_specs = [
                pl.BlockSpec((tm, tk), lambda i, j: (i, 0)),
                pl.BlockSpec((tk, tn), lambda i, j: (0, j)),
                pl.BlockSpec((1, tn), lambda i, j: (0, j)),
            ]
            args = (a_p, b_p, bias_p)
        else:
            kernel = functools.partial(_mm_res_kernel, act=act, slope=slope)
            in_specs = [
                pl.BlockSpec((tm, tk), lambda i, j: (i, 0)),
                pl.BlockSpec((tk, tn), lambda i, j: (0, j)),
                pl.BlockSpec((1, tn), lambda i, j: (0, j)),
                pl.BlockSpec((tm, tn), lambda i, j: (i, j)),
            ]
            args = (a_p, b_p, bias_p, res_p)
        grid = (nm, nn)
        out_specs = pl.BlockSpec((tm, tn), lambda i, j: (i, j))
        scratch = []
        dims = ("parallel", "parallel")
    else:
        assert res_p is None and act != "deform_head"
        kernel = functools.partial(_mm_ksplit_kernel, act=act, slope=slope)
        grid = (nm, nn, nk)
        in_specs = [
            pl.BlockSpec((tm, tk), lambda i, j, k: (i, k)),
            pl.BlockSpec((tk, tn), lambda i, j, k: (k, j)),
            pl.BlockSpec((1, tn), lambda i, j, k: (0, j)),
        ]
        args = (a_p, b_p, bias_p)
        out_specs = pl.BlockSpec((tm, tn), lambda i, j, k: (i, j))
        scratch = [pltpu.VMEM((tm, tn), jnp.float32)]
        dims = ("parallel", "parallel", "arbitrary")

    return pl.pallas_call(
        kernel,
        out_shape=jax.ShapeDtypeStruct((Mp, Np), out_dtype),
        grid_spec=pltpu.PrefetchScalarGridSpec(
            num_scalar_prefetch=0, grid=grid, in_specs=in_specs,
            out_specs=out_specs, scratch_shapes=scratch),
        compiler_params=pltpu.CompilerParams(
            dimension_semantics=dims, vmem_limit_bytes=vmem_limit),
    )(*args)


@functools.partial(jax.jit, static_argnames=("act", "slope", "tm", "tn", "out_dtype"))
def _gmm_call(a_p, b_p, bias_p, act, slope, tm, tn, out_dtype):
    G, Mp, Kp = a_p.shape
    _, _, Np = b_p.shape
    nm, nn = Mp // tm, Np // tn
    out_bytes = jnp.dtype(out_dtype).itemsize
    footprint = 2 * (2 * tm * Kp + 2 * Kp * tn + 4 * tn + out_bytes * tm * tn)
    vmem_limit = int(min(max(2 * footprint, 16 << 20), 48 << 20))
    kernel = functools.partial(_gmm_kernel, act=act, slope=slope)
    return pl.pallas_call(
        kernel,
        out_shape=jax.ShapeDtypeStruct((G, Mp, Np), out_dtype),
        grid_spec=pltpu.PrefetchScalarGridSpec(
            num_scalar_prefetch=0,
            grid=(G, nm, nn),
            in_specs=[
                pl.BlockSpec((None, tm, Kp), lambda g, i, j: (g, i, 0)),
                pl.BlockSpec((None, Kp, tn), lambda g, i, j: (g, 0, j)),
                pl.BlockSpec((None, 1, tn), lambda g, i, j: (g, 0, j)),
            ],
            out_specs=pl.BlockSpec((None, tm, tn), lambda g, i, j: (g, i, j)),
        ),
        compiler_params=pltpu.CompilerParams(
            dimension_semantics=("parallel", "parallel", "parallel"),
            vmem_limit_bytes=vmem_limit),
    )(a_p, b_p, bias_p)


def _choose_tn(N):
    # Full-N (weight-resident, single n block) up to 512 lanes; 256-wide tiles above that
    # so the v6e/v7x 256x256 MXU stays filled (v5e just sees two 128-lane passes).
    if N <= 512:
        Np = _round_up(N, 128)
        return Np, Np
    Np = _round_up(N, 256)
    return 256, Np


def _choose_tm(M):
    # Round M to 128 (small pad waste); keep >=2 row blocks once M >= 256 so both v7x
    # TensorCores get work; 256-row tiles for large M to cut per-step overhead.
    if M < 256:
        return M, M
    Mp = _round_up(M, 128)
    if Mp % 256 == 0 and Mp >= 1024:
        return 256, Mp
    return 128, Mp


def matmul_bias_act(a, b, bias=None, residual=None, act="none", slope=0.2, n_off=0,
                    out_dtype=jnp.bfloat16):
    """(M,K) @ (K,N) + bias, fused activation / residual, on the Pallas GEMM kernel."""
    M, K = a.shape
    Kb, N = b.shape
    assert K == Kb
    if bias is None:
        bias = jnp.zeros((N,), jnp.float32)

    tn, Np = _choose_tn(N)
    tm, Mp = _choose_tm(M)

    out_bytes = jnp.dtype(out_dtype).itemsize

    def fp(tk_):
        f = 2 * (2 * tm * tk_ + 2 * tk_ * tn + 4 * tn + out_bytes * tm * tn)
        if residual is not None:
            f += 2 * 2 * tm * tn
        return f

    budget = 28 * 1024 * 1024
    if fp(K) <= budget:
        tk, Kp = K, K
    else:
        tk = 2048
        while fp(tk) > budget and tk > 512:
            tk //= 2
        Kp = _round_up(K, tk)

    a_p = a.astype(jnp.bfloat16)
    b_p = b.astype(jnp.bfloat16)
    if (Mp, Kp) != (M, K):
        a_p = jnp.pad(a_p, ((0, Mp - M), (0, Kp - K)))
    if (Kp, Np) != (K, N):
        b_p = jnp.pad(b_p, ((0, Kp - K), (0, Np - N)))
    bias_p = bias.astype(jnp.float32).reshape(1, N)
    if Np != N:
        bias_p = jnp.pad(bias_p, ((0, 0), (0, Np - N)))
    res_p = None
    if residual is not None:
        res_p = residual.astype(jnp.bfloat16)
        if (Mp, Np) != (M, N):
            res_p = jnp.pad(res_p, ((0, Mp - M), (0, Np - N)))

    out = _mm_call(a_p, b_p, bias_p, res_p, act, float(slope), int(n_off),
                   tm, tn, tk, out_dtype)
    if (Mp, Np) != (M, N):
        out = out[:M, :N]
    return out


def grouped_matmul_bias_act(a, b, bias=None, act="none", slope=0.2, out_dtype=jnp.bfloat16):
    """Grouped GEMM: a (G,M,Kg) @ b (G,Kg,Ng) + bias (G,Ng), fused activation."""
    # TODO(synk): the (M,G,Kg)->(G,M,Kg) swap could be removed with a group-aware index_map,
    # but per-group Kg here is not 128-aligned, so the 3D layout is kept.
    G, M, K = a.shape
    G2, K2, N = b.shape
    assert G == G2 and K == K2
    if bias is None:
        bias = jnp.zeros((G, N), jnp.float32)
    tn, Np = _choose_tn(N)
    tm, Mp = _choose_tm(M)
    a_p = a.astype(jnp.bfloat16)
    b_p = b.astype(jnp.bfloat16)
    if Mp != M:
        a_p = jnp.pad(a_p, ((0, 0), (0, Mp - M), (0, 0)))
    if Np != N:
        b_p = jnp.pad(b_p, ((0, 0), (0, 0), (0, Np - N)))
    bias_p = bias.astype(jnp.float32).reshape(G, 1, N)
    if Np != N:
        bias_p = jnp.pad(bias_p, ((0, 0), (0, 0), (0, Np - N)))
    out = _gmm_call(a_p, b_p, bias_p, act, float(slope), tm, tn, out_dtype)
    if (Mp, Np) != (M, N):
        out = out[:, :M, :N]
    return out


# ----------------------------------------------------------------------------------
# Conv / linear wrappers (NHWC im2col glue in plain JAX, matmul on the Pallas kernel)
# ----------------------------------------------------------------------------------
def _im2col(x, kh, kw, stride, padding):
    # NHWC patches; feature dim is channel-major (C, kh, kw) = PyTorch unfold ordering,
    # so no layout transposes are needed around the GEMM.
    patches = jax.lax.conv_general_dilated_patches(
        x, (kh, kw), (stride, stride),
        [(padding, padding), (padding, padding)],
        dimension_numbers=("NHWC", "HWIO", "NHWC"))
    N, Ho, Wo, CK = patches.shape
    return patches.reshape(N * Ho * Wo, CK), (Ho, Wo)


def conv2d(x, cp, stride=1, padding=1, act="none", slope=0.2, residual=None,
           out_dtype=jnp.bfloat16):
    """3x3 conv on NHWC activations via im2col + fused Pallas GEMM (output stays NHWC)."""
    # TODO(synk): the 9x-materialized im2col could be replaced by in-kernel halo patch
    # generation for the stride-1 full-resolution convs to cut HBM traffic further.
    N, H, W, C = x.shape
    A, (Ho, Wo) = _im2col(x.astype(jnp.bfloat16), 3, 3, stride, padding)
    M = A.shape[0]
    if cp["groups"] == 1:
        res = None if residual is None else residual.reshape(M, -1)
        out = matmul_bias_act(A, cp["wm"], cp["b"], residual=res, act=act,
                              slope=slope, out_dtype=out_dtype)
        Cout = cp["wm"].shape[1]
    else:
        assert residual is None
        G, Kg, Ng = cp["wm"].shape
        Ag = jnp.swapaxes(A.reshape(M, G, Kg), 0, 1)                 # (G, M, Kg)
        og = grouped_matmul_bias_act(Ag, cp["wm"], cp["b"], act=act, slope=slope,
                                     out_dtype=out_dtype)
        out = jnp.swapaxes(og, 0, 1).reshape(M, G * Ng)
        Cout = G * Ng
    return out.reshape(N, Ho, Wo, Cout)


def linear(x, wm, b, act="none", slope=0.2, out_dtype=jnp.bfloat16):
    shp = x.shape
    y = matmul_bias_act(x.reshape(-1, shp[-1]), wm, b, act=act, slope=slope,
                        out_dtype=out_dtype)
    return y.reshape(*shp[:-1], wm.shape[1])


# ----------------------------------------------------------------------------------
# Resampling / warping helpers (gather-heavy, kept in plain JAX, NHWC layouts)
# ----------------------------------------------------------------------------------
# TODO(synk): gather-based sampling (grid_sample / deformable sampling / interpolate) has
# no clean rectangular-BlockSpec Pallas equivalent; kept in plain JAX.
def _bilinear_sample_nhwc(img, py, px):
    # img: (M, H, W, C); py, px: (M, L) pixel coordinates; zero padding outside -> (M, L, C)
    M, H, W, C = img.shape
    x0 = jnp.floor(px)
    y0 = jnp.floor(py)
    x1 = x0 + 1.0
    y1 = y0 + 1.0
    wx1 = px - x0
    wx0 = 1.0 - wx1
    wy1 = py - y0
    wy0 = 1.0 - wy1
    flat = img.reshape(M, H * W, C)

    def g(ix, iy, wt):
        valid = (ix >= 0) & (ix <= W - 1) & (iy >= 0) & (iy <= H - 1)
        ixc = jnp.clip(ix, 0, W - 1).astype(jnp.int32)
        iyc = jnp.clip(iy, 0, H - 1).astype(jnp.int32)
        idx = iyc * W + ixc
        v = jnp.take_along_axis(flat, idx[:, :, None], axis=1)
        return v * (wt * valid.astype(wt.dtype))[:, :, None]

    return (g(x0, y0, wx0 * wy0) + g(x1, y0, wx1 * wy0)
            + g(x0, y1, wx0 * wy1) + g(x1, y1, wx1 * wy1))


def grid_sample_bilinear(x, grid):
    # align_corners=True, padding_mode='zeros'; x: (N,H,W,C); grid: (N,Ho,Wo,2) normalized
    N, H, W, C = x.shape
    Ho, Wo = grid.shape[1:3]
    px = (grid[..., 0] + 1.0) * 0.5 * (W - 1)
    py = (grid[..., 1] + 1.0) * 0.5 * (H - 1)
    out = _bilinear_sample_nhwc(x, py.reshape(N, -1), px.reshape(N, -1))
    return out.reshape(N, Ho, Wo, C)


def flow_warp(x, flows):
    # x: (N,H,W,C); flows: (N,H,W,2)
    N, H, W, C = x.shape
    gy, gx = jnp.meshgrid(jnp.arange(H, dtype=jnp.float32),
                          jnp.arange(W, dtype=jnp.float32), indexing="ij")
    grid = jnp.stack([gx, gy], axis=-1)
    gf = flows.astype(jnp.float32) + grid
    gfx = 2.0 * gf[..., 0] / max(W - 1, 1) - 1.0
    gfy = 2.0 * gf[..., 1] / max(H - 1, 1) - 1.0
    return grid_sample_bilinear(x, jnp.stack([gfx, gfy], axis=-1))


def forward_backward_consistency_check(flow_fw, flow_bw, alpha1=0.01, alpha2=0.5):
    # flows: (N,H,W,2); returns bool (N,H,W,1)
    flow_bw_warped = flow_warp(flow_bw, flow_fw)
    flow_diff = flow_fw + flow_bw_warped
    mag = (jnp.sum(flow_fw ** 2, axis=-1, keepdims=True)
           + jnp.sum(flow_bw_warped ** 2, axis=-1, keepdims=True))
    thresh = alpha1 * mag + alpha2
    return jnp.sum(flow_diff ** 2, axis=-1, keepdims=True) < thresh


def interpolate_bilinear(x, out_h, out_w, align_corners=False):
    # x: (N,H,W,C)
    N, H, W, C = x.shape
    if align_corners:
        ys = jnp.arange(out_h, dtype=jnp.float32) * ((H - 1) / max(out_h - 1, 1))
        xs = jnp.arange(out_w, dtype=jnp.float32) * ((W - 1) / max(out_w - 1, 1))
    else:
        ys = jnp.maximum((jnp.arange(out_h, dtype=jnp.float32) + 0.5) * (H / out_h) - 0.5, 0.0)
        xs = jnp.maximum((jnp.arange(out_w, dtype=jnp.float32) + 0.5) * (W / out_w) - 0.5, 0.0)
    y0 = jnp.floor(ys).astype(jnp.int32)
    y1 = jnp.minimum(y0 + 1, H - 1)
    x0 = jnp.floor(xs).astype(jnp.int32)
    x1 = jnp.minimum(x0 + 1, W - 1)
    wy = (ys - y0.astype(jnp.float32))[None, :, None, None]
    wx = (xs - x0.astype(jnp.float32))[None, None, :, None]
    top = x[:, y0, :, :]
    bot = x[:, y1, :, :]
    rows = top * (1 - wy) + bot * wy
    return rows[:, :, x0, :] * (1 - wx) + rows[:, :, x1, :] * wx


def interpolate_nearest(x, out_h, out_w):
    N, H, W, C = x.shape
    ys = jnp.floor(jnp.arange(out_h, dtype=jnp.float32) * (H / out_h)).astype(jnp.int32)
    xs = jnp.floor(jnp.arange(out_w, dtype=jnp.float32) * (W / out_w)).astype(jnp.int32)
    return x[:, ys][:, :, xs]


def max_pool2d(x, k=7, s=3, p=3):
    # NHWC max pool
    return jax.lax.reduce_window(
        x, jnp.array(-jnp.inf, x.dtype), jax.lax.max,
        (1, k, k, 1), (1, s, s, 1), ((0, 0), (p, p), (p, p), (0, 0)))


def fold_nhwc(tokens, output_size, kernel_size, stride, padding):
    # F.fold (col2im) on NHWC tokens: (N, oh, ow, C*kh*kw) -> (N, H, W, C), overlaps summed.
    N, oh, ow, CK = tokens.shape
    kh, kw = kernel_size
    H, W = output_size
    C = CK // (kh * kw)
    p = tokens.reshape(N, oh, ow, C, kh, kw)
    out = jnp.zeros((N, H + 2 * padding, W + 2 * padding, C), tokens.dtype)
    for i in range(kh):
        for j in range(kw):
            out = out.at[:, i:i + (oh - 1) * stride + 1:stride,
                            j:j + (ow - 1) * stride + 1:stride, :].add(p[:, :, :, :, i, j])
    return out[:, padding:padding + H, padding:padding + W, :]


# ----------------------------------------------------------------------------------
# Modulated deformable conv (torchvision deform_conv2d semantics, NHWC)
# ----------------------------------------------------------------------------------
def deform_conv2d(x, offset, mask, wm, bias, stride=1, padding=1, dilation=1,
                  deform_groups=16, out_dtype=jnp.bfloat16):
    # x: (B,H,W,C); offset: (B,Ho,Wo,dg,K,2) (dy,dx); mask: (B,Ho,Wo,dg,K); wm: (C*K, Cout)
    B, H, W, C = x.shape
    K = offset.shape[-2]
    kh = kw = 3
    Ho = (H + 2 * padding - dilation * (kh - 1) - 1) // stride + 1
    Wo = (W + 2 * padding - dilation * (kw - 1) - 1) // stride + 1
    ki = jnp.arange(K) // kw
    kj = jnp.arange(K) % kw
    base_y = ((jnp.arange(Ho) * stride - padding)[:, None]
              + (ki * dilation)[None, :]).astype(jnp.float32)            # (Ho, K)
    base_x = ((jnp.arange(Wo) * stride - padding)[:, None]
              + (kj * dilation)[None, :]).astype(jnp.float32)            # (Wo, K)
    py = base_y[None, :, None, None, :] + offset[..., 0]                 # (B, Ho, Wo, dg, K)
    px = base_x[None, None, :, None, :] + offset[..., 1]
    dg = deform_groups
    Cg = C // dg
    imgs = x.reshape(B, H, W, dg, Cg).transpose(0, 3, 1, 2, 4).reshape(B * dg, H, W, Cg)
    pyl = py.transpose(0, 3, 1, 2, 4).reshape(B * dg, Ho * Wo * K)
    pxl = px.transpose(0, 3, 1, 2, 4).reshape(B * dg, Ho * Wo * K)
    sampled = _bilinear_sample_nhwc(imgs, pyl, pxl)                      # (B*dg, Ho*Wo*K, Cg)
    sampled = sampled.reshape(B, dg, Ho, Wo, K, Cg)
    sampled = sampled * mask.transpose(0, 3, 1, 2, 4)[..., None]
    A = sampled.transpose(0, 2, 3, 1, 5, 4).reshape(B * Ho * Wo, C * K)  # (Cin, kh*kw) order
    out = matmul_bias_act(A, wm, bias, out_dtype=out_dtype)              # Pallas DCN contraction
    return out.reshape(B, Ho, Wo, wm.shape[1])


# ----------------------------------------------------------------------------------
# Modules (all NHWC)
# ----------------------------------------------------------------------------------
def encoder_forward(convs, x):
    num_groups = [1, 2, 4, 8, 1]
    bsz = x.shape[0]
    out = x
    x0 = None
    h = w = None
    for i in range(18):
        if i == 8:
            x0 = out
            h, w = x0.shape[1:3]
        if i > 8 and i % 2 == 0:
            g = num_groups[(i - 8) // 2]
            xx = x0.reshape(bsz, h, w, g, -1)
            oo = out.reshape(bsz, h, w, g, -1)
            out = jnp.concatenate([xx, oo], axis=4).reshape(bsz, h, w, -1)
        if i % 2 == 0:
            ci = i // 2
            stride = 2 if ci in (0, 2) else 1
            out = conv2d(out, convs[ci], stride=stride, padding=1,
                         act="leaky_relu", slope=0.2)
    return out


def second_order_deform_align(p, x, cond, flow, max_residue_magnitude=3.0, deform_groups=16):
    h = conv2d(cond, p["co"][0], act="leaky_relu", slope=0.1)
    h = conv2d(h, p["co"][1], act="leaky_relu", slope=0.1)
    h = conv2d(h, p["co"][2], act="leaky_relu", slope=0.1)
    # Fused offset+mask head: ONE GEMM over all 27*dg output columns with a column-masked
    # epilogue (max_residue_magnitude*tanh for offsets, sigmoid for the modulation mask),
    # instead of two separate GEMMs over the same im2col matrix.
    B = h.shape[0]
    A, (Ho, Wo) = _im2col(h, 3, 3, 1, 1)
    dg = deform_groups
    n_off = 18 * dg
    om = matmul_bias_act(A, p["head_wm"], p["head_b"], act="deform_head",
                         slope=max_residue_magnitude, n_off=n_off, out_dtype=jnp.float32)
    om = om.reshape(B, Ho, Wo, 27 * dg)
    offset = om[..., :n_off].reshape(B, Ho, Wo, dg, 9, 2)
    mask = om[..., n_off:].reshape(B, Ho, Wo, dg, 9)
    flow_yx = flow[..., ::-1]                                   # flip: (x, y) -> (y, x)
    offset = offset + flow_yx[:, :, :, None, None, :].astype(offset.dtype)
    return deform_conv2d(x, offset, mask, p["dcn_wm"], p["dcn_b"],
                         stride=1, padding=1, dilation=1, deform_groups=deform_groups)


def bidirectional_propagation(params, x, flows_forward, flows_backward, input_masks):
    # x: (B,T,h,w,C); flows: (B,T-1,h,w,2); input_masks: (B,T,h,w,2) bool
    B, T = x.shape[:2]
    dt = x.dtype
    feats = {"input": [x[:, i] for i in range(T)]}
    masks = {"input": [input_masks[:, i].astype(dt) for i in range(T)]}
    prop_list = ["backward_1", "forward_1"]
    cache_list = ["input"] + prop_list
    for p_i, mod_name in enumerate(prop_list):
        feats[mod_name] = []
        masks[mod_name] = []
        if "backward" in mod_name:
            frame_indices = list(range(T))[::-1]
            flow_indices = frame_indices
            flows_for_prop = flows_forward
            flows_for_check = flows_backward
        else:
            frame_indices = list(range(T))
            flow_indices = list(range(-1, T - 1))
            flows_for_prop = flows_backward
            flows_for_check = flows_forward
        mp = params[mod_name]
        feat_prop = None
        for i, idx in enumerate(frame_indices):
            feat_current = feats[cache_list[p_i]][idx]
            mask_current = masks[cache_list[p_i]][idx]
            if i == 0:
                feat_prop = feat_current
            else:
                flow_prop = flows_for_prop[:, flow_indices[i]]
                flow_check = flows_for_check[:, flow_indices[i]]
                flow_valid = forward_backward_consistency_check(flow_prop, flow_check)
                feat_warped = flow_warp(feat_prop, flow_prop)
                cond = jnp.concatenate(
                    [feat_current.astype(jnp.bfloat16), feat_warped.astype(jnp.bfloat16),
                     flow_prop.astype(jnp.bfloat16), flow_valid.astype(jnp.bfloat16),
                     mask_current.astype(jnp.bfloat16)], axis=-1)
                feat_prop = second_order_deform_align(mp["deform_align"], feat_prop,
                                                      cond, flow_prop)
            feat = jnp.concatenate([feat_current, feat_prop, mask_current], axis=-1)
            bb = mp["backbone"]
            r = conv2d(feat, bb[0], act="leaky_relu", slope=0.2)
            # residual add fused into the second backbone conv's epilogue
            feat_prop = conv2d(r, bb[1], act="none", residual=feat_prop)
            feats[mod_name].append(feat_prop)
            masks[mod_name].append(mask_current)
        if "backward" in mod_name:
            feats[mod_name] = feats[mod_name][::-1]
            masks[mod_name] = masks[mod_name][::-1]
    outputs_b = jnp.stack(feats["backward_1"], axis=1)
    outputs_f = jnp.stack(feats["forward_1"], axis=1)
    cat = jnp.concatenate([outputs_b, outputs_f, input_masks.astype(dt)], axis=-1)
    h, w, Cc = cat.shape[2:]
    cat = cat.reshape(B * T, h, w, Cc)
    fu = params["fusion"]
    o = conv2d(cat, fu[0], act="leaky_relu", slope=0.2)
    C = x.shape[-1]
    o = conv2d(o, fu[1], act="none", residual=x.reshape(B * T, h, w, C))   # fused + x
    outputs = o.reshape(B, T, h, w, C)
    return outputs_b, outputs_f, outputs, None


def soft_split(p, x, kernel_size=7, stride=3, padding=3):
    B, T, H, W, C = x.shape
    xf = x.reshape(B * T, H, W, C)
    tokens, (Ho, Wo) = _im2col(xf.astype(jnp.bfloat16), kernel_size, kernel_size,
                               stride, padding)
    emb = matmul_bias_act(tokens, p["wm"], p["b"])
    return emb.reshape(B, T, Ho, Wo, -1)


def soft_comp(p, x, output_size, residual=None, kernel_size=7, stride=3, padding=3,
              in_channels=128):
    B, T, Ho, Wo, Cd = x.shape
    H, W = output_size
    tokens = x.reshape(B * T * Ho * Wo, Cd)
    emb = matmul_bias_act(tokens, p["embedding"]["wm"], p["embedding"]["b"])
    emb = emb.reshape(B * T, Ho, Wo, -1)
    folded = fold_nhwc(emb, output_size, (kernel_size, kernel_size), stride, padding)
    res = None if residual is None else residual.reshape(B * T, H, W, in_channels)
    out = conv2d(folded, p["bias_conv"], act="none", residual=res)         # fused + residual
    return out.reshape(B, T, H, W, in_channels)


def layer_norm(x, g, b, eps=1e-5):
    x32 = x.astype(jnp.float32)
    m = jnp.mean(x32, -1, keepdims=True)
    v = jnp.var(x32, -1, keepdims=True)
    return (x32 - m) / jnp.sqrt(v + eps) * g + b


def transformer_forward(layers, x, masks=None, temporal_dilation=2, nhead=4):
    # TODO(synk): TemporalSparseTransformer source not provided; approximated as a stack of
    # dense pre-norm transformer blocks over all spatio-temporal tokens (window/pool/mask
    # sparsity and temporal_dilation selection not reproduced).
    B, T, Ho, Wo, D = x.shape
    L = T * Ho * Wo
    dh = D // nhead
    h = x.reshape(B, L, D)
    for lp in layers:
        hn = layer_norm(h, lp["ln1_g"], lp["ln1_b"])
        qkv = linear(hn, lp["wqkv"], lp["bqkv"])          # fused QKV: one Pallas GEMM
        q, k, v = jnp.split(qkv, 3, axis=-1)
        qh = q.reshape(B, L, nhead, dh).transpose(0, 2, 1, 3)
        kh = k.reshape(B, L, nhead, dh).transpose(0, 2, 1, 3)
        vh = v.reshape(B, L, nhead, dh).transpose(0, 2, 1, 3)
        # TODO(synk): dense attention kept in XLA; a flash-attention Pallas kernel is the
        # scaling fix for real resolutions where the LxL score matrix dominates HBM traffic.
        attn = jnp.einsum("bhqd,bhkd->bhqk", qh, kh,
                          preferred_element_type=jnp.float32) / jnp.sqrt(dh)
        attn = jax.nn.softmax(attn, axis=-1)
        o = jnp.einsum("bhqk,bhkd->bhqd", attn.astype(vh.dtype), vh)
        o = o.transpose(0, 2, 1, 3).reshape(B, L, D)
        h = h + linear(o, lp["proj"]["wm"], lp["proj"]["b"])
        hn = layer_norm(h, lp["ln2_g"], lp["ln2_b"])
        f = linear(hn, lp["fc1"]["wm"], lp["fc1"]["b"])
        # Exact-erf GELU (PyTorch nn.GELU default); applied outside the kernel epilogue
        # because erf is not guaranteed to lower in Mosaic.
        f = jax.nn.gelu(f.astype(jnp.float32), approximate=False).astype(jnp.bfloat16)
        f = linear(f, lp["fc2"]["wm"], lp["fc2"]["b"])
        h = h + f
    return h.reshape(B, T, Ho, Wo, D)


def decoder_forward(p, x):
    # TODO(synk): Deconv class not provided; implemented as 2x bilinear upsample
    # (align_corners=True) + 3x3 conv, matching ProPainter's deconv.
    x = interpolate_bilinear(x, 2 * x.shape[1], 2 * x.shape[2], align_corners=True)
    x = conv2d(x, p["deconv1"], act="leaky_relu", slope=0.2)
    x = conv2d(x, p["conv1"], act="leaky_relu", slope=0.2)
    x = interpolate_bilinear(x, 2 * x.shape[1], 2 * x.shape[2], align_corners=True)
    x = conv2d(x, p["deconv2"], act="leaky_relu", slope=0.2)
    x = conv2d(x, p["conv2"], act="tanh", out_dtype=jnp.float32)   # final tanh fused, f32 out
    return x


def inpaint_generator_forward(params, masked_frames, completed_flows, input_masks,
                              updated_masks, num_local_frames):
    # External interface is PyTorch NCHW; converted ONCE to NHWC internally.
    B, T, _, H0, W0 = masked_frames.shape
    nlf = num_local_frames
    frames = jnp.transpose(masked_frames, (0, 1, 3, 4, 2))
    im = jnp.transpose(input_masks, (0, 1, 3, 4, 2))
    um = jnp.transpose(updated_masks, (0, 1, 3, 4, 2))
    feats_in = jnp.concatenate([frames, im, um], axis=-1).reshape(B * T, H0, W0, 5)
    enc = encoder_forward(params["encoder"], feats_in)
    feats = enc.reshape(B, T, *enc.shape[1:])
    h, w = feats.shape[2:4]
    local_feats = feats[:, :nlf]
    ref_feats = feats[:, nlf:]

    ff = jnp.transpose(completed_flows[0], (0, 1, 3, 4, 2)).reshape(B * (nlf - 1), H0, W0, 2)
    fb = jnp.transpose(completed_flows[1], (0, 1, 3, 4, 2)).reshape(B * (nlf - 1), H0, W0, 2)
    ds_flows_f = (interpolate_bilinear(ff, H0 // 4, W0 // 4) / 4.0).reshape(B, nlf - 1, h, w, 2)
    ds_flows_b = (interpolate_bilinear(fb, H0 // 4, W0 // 4) / 4.0).reshape(B, nlf - 1, h, w, 2)

    ds_im = interpolate_nearest(im.reshape(B * T, H0, W0, 1), H0 // 4, W0 // 4)
    ds_input_masks = (ds_im != 0).reshape(B, T, h, w, 1)
    local_ds_input_masks = ds_input_masks[:, :nlf]
    ds_um = interpolate_nearest(um[:, :nlf].reshape(B * nlf, H0, W0, 1), H0 // 4, W0 // 4)
    local_ds_updated_masks = (ds_um != 0).reshape(B, nlf, h, w, 1)
    prop_masks = jnp.concatenate([local_ds_input_masks, local_ds_updated_masks], axis=-1)

    _, _, local_feats, _ = bidirectional_propagation(
        params["feat_prop"], local_feats, ds_flows_f, ds_flows_b, prop_masks)
    feats = jnp.concatenate([local_feats, ref_feats], axis=1)

    mpool = max_pool2d(local_ds_input_masks.reshape(B * nlf, h, w, 1).astype(feats.dtype),
                       7, 3, 3)
    mask_pool_l = mpool.reshape(B, nlf, mpool.shape[1], mpool.shape[2], 1)

    residual = feats
    output_size = (h, w)
    hidden = soft_split(params["ss"], feats)
    hidden = transformer_forward(params["transformer"], hidden, masks=mask_pool_l,
                                 temporal_dilation=2)
    feats = soft_comp(params["sc"], hidden, output_size, residual=residual)

    dec_in = feats[:, :nlf].reshape(B * nlf, h, w, feats.shape[-1])
    out = decoder_forward(params["decoder"], dec_in)
    out = out.reshape(B, nlf, H0, W0, 3)
    return jnp.transpose(out, (0, 1, 4, 2, 3))


# ----------------------------------------------------------------------------------
# Deterministic synthetic parameters (PyTorch layout) + one-time GEMM-ready preparation
# ----------------------------------------------------------------------------------
def _init_conv(key, cout, cin, k=3):
    w = jax.random.normal(key, (cout, cin, k, k), jnp.float32) * (1.0 / np.sqrt(cin * k * k))
    return {"w": w, "b": jnp.zeros((cout,), jnp.float32)}


def _init_linear(key, cout, cin):
    w = jax.random.normal(key, (cout, cin), jnp.float32) * (1.0 / np.sqrt(cin))
    return {"w": w, "b": jnp.zeros((cout,), jnp.float32)}


def make_params(key):
    kit = iter(jax.random.split(key, 256))
    nk = lambda: next(kit)
    params = {}
    enc_defs = [(64, 5), (64, 64), (128, 64), (256, 128), (384, 256),
                (512, 320), (384, 192), (256, 80), (128, 512)]
    params["encoder"] = [_init_conv(nk(), co, ci) for co, ci in enc_defs]

    def make_align():
        return {
            "conv_offset": [_init_conv(nk(), 128, 261), _init_conv(nk(), 128, 128),
                            _init_conv(nk(), 128, 128), _init_conv(nk(), 27 * 16, 128)],
            "weight": jax.random.normal(nk(), (128, 128, 3, 3), jnp.float32) / np.sqrt(128 * 9),
            "bias": jnp.zeros((128,), jnp.float32),
        }

    def make_backbone():
        return [_init_conv(nk(), 128, 258), _init_conv(nk(), 128, 128)]

    params["feat_prop"] = {
        "backward_1": {"deform_align": make_align(), "backbone": make_backbone()},
        "forward_1": {"deform_align": make_align(), "backbone": make_backbone()},
        "fusion": [_init_conv(nk(), 128, 258), _init_conv(nk(), 128, 128)],
    }
    params["ss"] = _init_linear(nk(), 512, 7 * 7 * 128)
    params["sc"] = {"embedding": _init_linear(nk(), 7 * 7 * 128, 512),
                    "bias_conv": _init_conv(nk(), 128, 128)}
    params["transformer"] = [{
        "ln1_g": jnp.ones((512,), jnp.float32), "ln1_b": jnp.zeros((512,), jnp.float32),
        "q": _init_linear(nk(), 512, 512), "k": _init_linear(nk(), 512, 512),
        "v": _init_linear(nk(), 512, 512), "proj": _init_linear(nk(), 512, 512),
        "ln2_g": jnp.ones((512,), jnp.float32), "ln2_b": jnp.zeros((512,), jnp.float32),
        "fc1": _init_linear(nk(), 1024, 512), "fc2": _init_linear(nk(), 512, 1024),
    } for _ in range(8)]
    params["decoder"] = {
        "deconv1": _init_conv(nk(), 128, 128),
        "conv1": _init_conv(nk(), 64, 128),
        "deconv2": _init_conv(nk(), 64, 64),
        "conv2": _init_conv(nk(), 3, 64),
    }
    return params


def _prep_conv(p, groups=1):
    w, b = p["w"], p["b"]
    cout, cin_g, kh, kw = w.shape
    if groups == 1:
        return {"wm": w.reshape(cout, cin_g * kh * kw).T.astype(jnp.bfloat16),
                "b": b.astype(jnp.float32), "groups": 1}
    G = groups
    ng = cout // G
    wm = w.reshape(G, ng, cin_g * kh * kw).transpose(0, 2, 1).astype(jnp.bfloat16)  # (G,Kg,Ng)
    return {"wm": wm, "b": b.reshape(G, ng).astype(jnp.float32), "groups": G}


def _prep_linear(p):
    return {"wm": p["w"].T.astype(jnp.bfloat16), "b": p["b"].astype(jnp.float32)}


def prepare_params(raw):
    """One-time conversion of PyTorch-layout weights into bf16 GEMM-ready matrices."""
    groups_per_conv = [1, 1, 1, 1, 1, 2, 4, 8, 1]
    p = {"encoder": [_prep_conv(c, g) for c, g in zip(raw["encoder"], groups_per_conv)]}

    def prep_align(a):
        co = a["conv_offset"]
        return {
            "co": [_prep_conv(co[0]), _prep_conv(co[1]), _prep_conv(co[2])],
            "head_wm": co[3]["w"].reshape(co[3]["w"].shape[0], -1).T.astype(jnp.bfloat16),
            "head_b": co[3]["b"].astype(jnp.float32),
            "dcn_wm": a["weight"].reshape(a["weight"].shape[0], -1).T.astype(jnp.bfloat16),
            "dcn_b": a["bias"].astype(jnp.float32),
        }

    def prep_prop(m):
        return {"deform_align": prep_align(m["deform_align"]),
                "backbone": [_prep_conv(c) for c in m["backbone"]]}

    p["feat_prop"] = {
        "backward_1": prep_prop(raw["feat_prop"]["backward_1"]),
        "forward_1": prep_prop(raw["feat_prop"]["forward_1"]),
        "fusion": [_prep_conv(c) for c in raw["feat_prop"]["fusion"]],
    }
    p["ss"] = _prep_linear(raw["ss"])
    p["sc"] = {"embedding": _prep_linear(raw["sc"]["embedding"]),
               "bias_conv": _prep_conv(raw["sc"]["bias_conv"])}
    p["transformer"] = []
    for lp in raw["transformer"]:
        wqkv = jnp.concatenate([lp["q"]["w"], lp["k"]["w"], lp["v"]["w"]],
                               axis=0).T.astype(jnp.bfloat16)
        bqkv = jnp.concatenate([lp["q"]["b"], lp["k"]["b"], lp["v"]["b"]]).astype(jnp.float32)
        p["transformer"].append({
            "ln1_g": lp["ln1_g"], "ln1_b": lp["ln1_b"],
            "ln2_g": lp["ln2_g"], "ln2_b": lp["ln2_b"],
            "wqkv": wqkv, "bqkv": bqkv,
            "proj": _prep_linear(lp["proj"]),
            "fc1": _prep_linear(lp["fc1"]),
            "fc2": _prep_linear(lp["fc2"]),
        })
    p["decoder"] = {k: _prep_conv(v) for k, v in raw["decoder"].items()}
    return p


if __name__ == "__main__":
    key = jax.random.PRNGKey(0)
    pkey, dkey = jax.random.split(key)
    raw_params = make_params(pkey)
    params = prepare_params(raw_params)

    B, T, H0, W0 = 1, 4, 32, 32
    nlf = 3
    k1, k2, k3, k4, k5 = jax.random.split(dkey, 5)
    masked_frames = jax.random.normal(k1, (B, T, 3, H0, W0), jnp.float32)
    flows_f = jax.random.normal(k2, (B, nlf - 1, 2, H0, W0), jnp.float32) * 2.0
    flows_b = jax.random.normal(k3, (B, nlf - 1, 2, H0, W0), jnp.float32) * 2.0
    input_masks = (jax.random.uniform(k4, (B, T, 1, H0, W0)) > 0.7).astype(jnp.float32)
    updated_masks = (jax.random.uniform(k5, (B, T, 1, H0, W0)) > 0.8).astype(jnp.float32)

    out = inpaint_generator_forward(params, masked_frames, (flows_f, flows_b),
                                    input_masks, updated_masks, nlf)
    out = jax.block_until_ready(out)
    assert out.shape == (B, nlf, 3, H0, W0), out.shape
    assert bool(jnp.all(jnp.isfinite(out)))
    print("KERNEL_OK")
</pallas_src>

<mosaic_0001>
module attributes {stable_mosaic.version = 11 : i64} {
  func.func @_mm_kernel(%arg0: i32, %arg1: i32, %arg2: memref<256x45xbf16, #tpu.memory_space<vmem>>, %arg3: memref<45x128xbf16, #tpu.memory_space<vmem>>, %arg4: memref<1x128xf32, #tpu.memory_space<vmem>>, %arg5: memref<256x128xbf16, #tpu.memory_space<vmem>>) attributes {dimension_semantics = [#tpu.dimension_semantics<parallel>, #tpu.dimension_semantics<parallel>], iteration_bounds = array<i64: 4, 1>, scalar_prefetch = 0 : i64, scratch_operands = 0 : i64, tpu.core_type = #tpu.core_type<tc>, window_params = [{transform_indices = @transform_0, window_bounds = array<i64: 256, 45>}, {transform_indices = @transform_1, window_bounds = array<i64: 45, 128>}, {transform_indices = @transform_2, window_bounds = array<i64: 1, 128>}, {transform_indices = @transform_3, window_bounds = array<i64: 256, 128>}]} {
    %c0 = arith.constant 0 : index
    %c0_0 = arith.constant 0 : index
    %0 = vector.load %arg2[%c0, %c0_0] : memref<256x45xbf16, #tpu.memory_space<vmem>>, vector<256x45xbf16>
    %c0_1 = arith.constant 0 : index
    %c0_2 = arith.constant 0 : index
    %1 = vector.load %arg3[%c0_1, %c0_2] : memref<45x128xbf16, #tpu.memory_space<vmem>>, vector<45x128xbf16>
    %cst = arith.constant dense<0.000000e+00> : vector<256x128xf32>
    %2 = tpu.matmul %0, %1, %cst {dimension_numbers = #tpu.dot_dimension_numbers<[1], [0], [0], [1], [0, 0, 1, 1], [], []>} : vector<256x45xbf16>, vector<45x128xbf16>, vector<256x128xf32> -> vector<256x128xf32>
    %c0_3 = arith.constant 0 : index
    %c0_4 = arith.constant 0 : index
    %3 = vector.load %arg4[%c0_3, %c0_4] : memref<1x128xf32, #tpu.memory_space<vmem>>, vector<1x128xf32>
    %4 = vector.broadcast %3 : vector<1x128xf32> to vector<256x128xf32>
    %5 = arith.addf %2, %4 : vector<256x128xf32>
    %cst_5 = arith.constant 0.000000e+00 : f32
    %6 = vector.broadcast %cst_5 : f32 to vector<256x128xf32>
    %7 = arith.cmpf oge, %5, %6 : vector<256x128xf32>
    %cst_6 = arith.constant 2.000000e-01 : f32
    %8 = vector.broadcast %cst_6 : f32 to vector<256x128xf32>
    %9 = arith.mulf %8, %5 : vector<256x128xf32>
    %10 = arith.select %7, %5, %9 : vector<256x128xi1>, vector<256x128xf32>
    %11 = arith.truncf %10 : vector<256x128xf32> to vector<256x128xbf16>
    %c0_7 = arith.constant 0 : index
    %c0_8 = arith.constant 0 : index
    %12 = vector.load %arg5[%c0_7, %c0_8] : memref<256x128xbf16, #tpu.memory_space<vmem>>, vector<256x128xbf16>
    tpu.vector_store %arg5[%c0_7, %c0_8], %11 {strides = array<i32>} : memref<256x128xbf16, #tpu.memory_space<vmem>>, vector<256x128xbf16>,
    return
  }
  func.func @transform_0(%arg0: i32, %arg1: i32) -> (i32, i32) {
    %c0_i32 = arith.constant 0 : i32
    %c0_i32_0 = arith.constant 0 : i32
    return %arg0, %c0_i32 : i32, i32
  }
  func.func @transform_1(%arg0: i32, %arg1: i32) -> (i32, i32) {
    %c0_i32 = arith.constant 0 : i32
    %c0_i32_0 = arith.constant 0 : i32
    return %c0_i32, %arg1 : i32, i32
  }
  func.func @transform_2(%arg0: i32, %arg1: i32) -> (i32, i32) {
    %c0_i32 = arith.constant 0 : i32
    %c0_i32_0 = arith.constant 0 : i32
    return %c0_i32, %arg1 : i32, i32
  }
  func.func @transform_3(%arg0: i32, %arg1: i32) -> (i32, i32) {
    %c0_i32 = arith.constant 0 : i32
    return %arg0, %arg1 : i32, i32
  }
}

</mosaic_0001>

<bundles_post_ra>
// kernel: _mm_call.1
= control target key start
LH: loop header
LB: loop body
LE: loop exit
PB: predicated region body
PF: predicated region fallthrough
CT: control target
= control target key end

     0   :  { %8 = vsyncpa [#allocation3], 0  ;;  %s1373_s0 = inlined_call_operand.vmem [shape: bf16[1024,45], index: 0, kind: input, shape index: {}]   ;;  %s1374_s1 = inlined_call_operand.vmem [shape: bf16[45,128], index: 1, kind: input, shape index: {}]   ;;  %s1375_s2 = inlined_call_operand.vmem [shape: f32[1,128], index: 2, kind: input, shape index: {}]   ;;  %s1376_s3 = inlined_call_operand.hbm [shape: bf16[1024,128], index: 3, kind: output, shape index: {}]  }
   0x1   :  { %10 = vsyncpa [#allocation3 + $0x1], 0  ;;  %s1171_s12 = smov 0   ;;  %s1173_s13 = smov 0  }
   0x2   :  { %s1175_s14 = smov 0   ;;  %s1177_s15 = smov 0  }
   0x3   :  { %s1179_s16 = smov 0   ;;  %s1181_s17 = smov 0  }
   0x4 LB: > { %s778_s18 = sadd.s32 4294967295, %s1146_s17   ;;  %s779_s19 = sadd.s32 4294967294, %s1146_s17   ;;  %s1146_s17 = sphi %s1181_s17, %s16_s17   ;;  %s1142_s16 = sphi %s1179_s16, %s1383_s16   ;;  %s1138_s15 = sphi %s1177_s15, %s1382_s15   ;;  %s1134_s14 = sphi %s1175_s14, %s1381_s14   ;;  %s1130_s13 = sphi %s1173_s13, %s1380_s13   ;;  %s1126_s12 = sphi %s1171_s12, %s1379_s12  }
   0x5   : > { %s28_s20 = sadd.s32 1, %s1142_s16  ;;  %s115_s21 = sadd.s32 1, %s1134_s14 }
   0x6   : > { %p30_p0 = scmp.ge.s32.totalorder %s28_s20, 4  ;;  %p125_p1 = scmp.ne.s32.totalorder %s1134_s14, %s1130_s13 }
   0x7   : > { %p126_p2 = scmp.eq.s32.totalorder %s778_s18, 3  ;;  %p131_p3 = scmp.ne.s32.totalorder %s1130_s13, %s1126_s12 }
   0x8   : > { %s1385_s20 = smov (%p30_p0, %s28_s20), 0  ;;  %p132_p5 = scmp.eq.s32.totalorder %s779_s19, 3 }
   0x9   : > { %p1211_p4 = por %p126_p2, %p125_p1  ;;  %s110_s23 = ssub.s32 %s1142_s16, %s1385_s20 }
   0xa   : > { %p784_p6 = scmp.ge.s32.totalorder %s1146_s17, 1  ;;  %p113_p7 = scmp.eq.s32.totalorder %s110_s23, 0 }
   0xb   : > { %p1218_p8 = por %p132_p5, %p131_p3  ;;  %p172_p9 = scmp.lt.s32.totalorder %s1146_s17, 5 }
   0xc   : > { %s1224_s25 = scalar_select %p113_p7, %s1134_s14, %s115_s21  }
   0xd   : > { %p173_p10 = pnand %p784_p6, %p172_p9 }
   0xe   : > { %s786_s30 = sshll.u32 (!%p173_p10), %s1138_s15, 5  ;;  %s200_s21 = sand.u32 (!%p173_p10), 1, %s1130_s13  }
   0xf   : > { %176 = sbr.rel (%p173_p10) target bundleno = 238 (0xee), region = 32  ;;  %p204_p11 = scmp.lt.s32.totalorder (!%p173_p10), %s786_s30, 127 }
  0x10   : > { %s785_s23 = sshll.u32 (!%p173_p10), %s200_s21, 7  ;;  %s904_s27 = sshll.u32 (!%p173_p10), %s1138_s15, 7 }
  0x11   : > { %s1290_s26 = scalar_lea.vmem (!%p173_p10), [#allocation2], %s785_s23  ;;  %s675_s15 = scalar_lea.hbm (!%p173_p10), %s1376_s3, %s904_s27 }
  0x12   : > { %s678_s4 = sshll.u32 (!%p173_p10), %s675_s15, 4  ;;  %s663_s5 = scalar_lea.sflag (!%p173_p10), [#allocation3], %s200_s21  ;;  %s679_s4 = int_to_ptr.hbm [resolvable:$true] %s678_s4 }
  0x13   : > { %s1088_s10 = scalar_lea.hbm (!%p173_p10), %s1376_s3, 512 }
  0x14   : > { %v862_v0 = vld [vmem:[%s1374_s1 + $0x10] sm:$0xf]  ;;  %v903_v1 = vld [vmem:[%s1374_s1 + $0x10] sm:$0x70]  ;;  %vm406_vm0 = vcmask 1045504   ;;  %vm407_vm1 = vcmask 1046528  }
  0x15   : > { %v863_v2 = vor.u32 %v903_v1, %v862_v0  ;;  %v1148_v3 = vmov 65535   ;;  %s1387_s30 = smov (!%p204_p11, %s786_s30), 127  ;;  %v902_v7 = vld [vmem:[%s1374_s1 + $0x8] sm:$0xff]  ;;  %v901_v8 = vld [vmem:[%s1374_s1] sm:$0xff]  ;;  %vm357_vm2 = vcmask 367616  }
  0x16   : > { %v408_v4 = vsel %vm406_vm0, 4294967295, %v1148_v3  ;;  %s787_s6 = sshll.u32 %s1387_s30, 2  ;;  %v1279_v27 = vld [vmem:[%s1375_s2] ss:$0 sm:$0xff]  ;;  %s676_s30 = sshll.u32 %s1290_s26, 4  ;;  %s677_s30 = int_to_ptr.vmem [resolvable:$true] %s676_s30 }
  0x17   : > { %v409_v5 = vsel %vm407_vm1, %v408_v4, 0  ;;  %s1242_s11 = scalar_lea.vmem %s1373_s0, %s787_s6  ;;  %s1082_s6 = sshra.s32 %s679_s4, 4  ;;  %s1083_s6 = int_to_ptr.hbm [resolvable:$true] %s1082_s6 }
  0x18   : > { %v411_v6 = vand.u32 %v863_v2, %v409_v5  ;;  %v885_v9 = vld [vmem:[%s1242_s11] sm:$0xff]  ;;  %v886_v13 = vld [vmem:[%s1242_s11 + $0x8] sm:$0xff]  ;;  %v887_v17 = vld [vmem:[%s1242_s11 + $0x10] sm:$0xff]  ;;  %s1084_s7 = scalar_lea.hbm %s1083_s6, 128  ;;  %p1089_p1 = scmp.lt.s32.totalorder %s1083_s6, %s1376_s3 }
  0x19   : > { %v889_v10 = vld [vmem:[%s1242_s11 + $0x20] sm:$0xff]  ;;  %v890_v14 = vld [vmem:[%s1242_s11 + $0x28] sm:$0xff]  ;;  %v891_v18 = vld [vmem:[%s1242_s11 + $0x30] sm:$0xff]  ;;  %p1085_p12 = scmp.ne.s32.totalorder %s1083_s6, %s1084_s7  ;;  %p1090_p2 = scmp.lt.s32.totalorder %s1088_s10, %s1084_s7 }
  0x1a   : > { %418 = vmatpush.bf16.msra.mxu0 %v411_v6  ;;  %1000 = vmatpush.bf16.msra.mxu1 %v411_v6  ;;  %v893_v11 = vld [vmem:[%s1242_s11 + $0x40] sm:$0xff]  ;;  %v894_v15 = vld [vmem:[%s1242_s11 + $0x48] sm:$0xff]  ;;  %v895_v19 = vld [vmem:[%s1242_s11 + $0x50] sm:$0xff] }
  0x1b   : > { %1001 = vmatpush.bf16.msra.mxu2 %v411_v6  ;;  %1002 = vmatpush.bf16.msra.mxu3 %v411_v6  ;;  %v897_v12 = vld [vmem:[%s1242_s11 + $0x60] sm:$0xff]  ;;  %v898_v16 = vld [vmem:[%s1242_s11 + $0x68] sm:$0xff]  ;;  %v899_v20 = vld [vmem:[%s1242_s11 + $0x70] sm:$0xff]  ;;  %p1086_p13 = pnand %p1085_p12, %p1211_p4  ;;  %p1091_p3 = por %p1090_p2, %p1089_p1 }
  0x1c   : > { %v888_v21 = vld [vmem:[%s1242_s11 + $0x18] sm:$0xff] }
  0x1d   : > { %v892_v22 = vld [vmem:[%s1242_s11 + $0x38] sm:$0xff]  ;;  %p1087_p0 = pneg %p1086_p13 }
  0x1e   : > { %419 = vmatpush.bf16.msra.mxu0 %v902_v7  ;;  %1003 = vmatpush.bf16.msra.mxu1 %v902_v7  ;;  %v896_v23 = vld [vmem:[%s1242_s11 + $0x58] sm:$0xff] }
  0x1f   : > { %1004 = vmatpush.bf16.msra.mxu2 %v902_v7  ;;  %1005 = vmatpush.bf16.msra.mxu3 %v902_v7  ;;  %v900_v24 = vld [vmem:[%s1242_s11 + $0x78] sm:$0xff]  ;;  %p1092_p5 = pnand %p1091_p3, %p1087_p0 }
  0x22   : > { %420 = vmatpush.bf16.msra.mxu0 %v901_v8  ;;  %1006 = vmatpush.bf16.msra.mxu1 %v901_v8 }
  0x23   : > { %1007 = vmatpush.bf16.msra.mxu2 %v901_v8  ;;  %1008 = vmatpush.bf16.msra.mxu3 %v901_v8 }
  0x25   : > { %864 = vmatmul.msk.bf16.vlgmr.msra.gmra.mxu0 %vm357_vm2, %v885_v9  ;;  %868 = vmatmul.msk.bf16.vlgmr.msra.gmra.mxu1 %vm357_vm2, %v889_v10 }
  0x26   : > { %872 = vmatmul.msk.bf16.vlgmr.msra.gmra.mxu2 %vm357_vm2, %v893_v11  ;;  %876 = vmatmul.msk.bf16.vlgmr.msra.gmra.mxu3 %vm357_vm2, %v897_v12 }
  0x35   : > { %865 = vmatmul.msk.bf16.gmra.mxu0 %vm357_vm2, %v886_v13  ;;  %869 = vmatmul.msk.bf16.gmra.mxu1 %vm357_vm2, %v890_v14 }
  0x36   : > { %873 = vmatmul.msk.bf16.gmra.mxu2 %vm357_vm2, %v894_v15  ;;  %877 = vmatmul.msk.bf16.gmra.mxu3 %vm357_vm2, %v898_v16 }
  0x45   : > { %866 = vmatmul.msk.bf16.gmra.mxu0 %vm357_vm2, %v887_v17  ;;  %870 = vmatmul.msk.bf16.gmra.mxu1 %vm357_vm2, %v891_v18 }
  0x46   : > { %874 = vmatmul.msk.bf16.gmra.mxu2 %vm357_vm2, %v895_v19  ;;  %878 = vmatmul.msk.bf16.gmra.mxu3 %vm357_vm2, %v899_v20 }
  0x55   : > { %867 = vmatmul.msk.bf16.gmra.mxu0 %vm357_vm2, %v888_v21  ;;  %871 = vmatmul.msk.bf16.gmra.mxu1 %vm357_vm2, %v892_v22 }
  0x56   : > { %875 = vmatmul.msk.bf16.gmra.mxu2 %vm357_vm2, %v896_v23  ;;  %879 = vmatmul.msk.bf16.gmra.mxu3 %vm357_vm2, %v900_v24 }
  0xa2   : > { %v422_v25 = vpop.f32.mrf.mxu0  ;;  %v442_v26 = vpop.f32.mrf.mxu1 }
  0xa3   : > { %v423_v28 = vadd.f32 %v1279_v27, %v422_v25  ;;  %v443_v29 = vadd.f32 %v1279_v27, %v442_v26 }
  0xa5   : > { %v534_v34 = vmul.f32 0.2, %v423_v28  ;;  %v542_v35 = vmul.f32 0.2, %v443_v29  ;;  %vm502_vm3 = vcmp.ge.f32.partialorder %v423_v28, 0.0  ;;  %vm510_vm4 = vcmp.ge.f32.partialorder %v443_v29, 0.0 }
  0xa7   : > { %v566_v42 = vsel %vm502_vm3, %v423_v28, %v534_v34  ;;  %v574_v43 = vsel %vm510_vm4, %v443_v29, %v542_v35 }
  0xa9   : > { %v462_v30 = vpop.f32.mrf.mxu2  ;;  %v482_v31 = vpop.f32.mrf.mxu3 }
  0xaa   : > { %v424_v32 = vpop.f32.mrf.mxu0  ;;  %v444_v33 = vpop.f32.mrf.mxu1  ;;  %v463_v40 = vadd.f32 %v1279_v27, %v462_v30  ;;  %v483_v41 = vadd.f32 %v1279_v27, %v482_v31 }
  0xab   : > { %v425_v36 = vadd.f32 %v1279_v27, %v424_v32  ;;  %v445_v37 = vadd.f32 %v1279_v27, %v444_v33 }
  0xac   : > { %v550_v50 = vmul.f32 0.2, %v463_v40  ;;  %v558_v51 = vmul.f32 0.2, %v483_v41  ;;  %vm518_vm7 = vcmp.ge.f32.partialorder %v463_v40, 0.0  ;;  %vm526_vm8 = vcmp.ge.f32.partialorder %v483_v41, 0.0 }
  0xad   : > { %vm503_vm5 = vcmp.ge.f32.partialorder %v425_v36, 0.0  ;;  %v535_v38 = vmul.f32 0.2, %v425_v36  ;;  %vm511_vm6 = vcmp.ge.f32.partialorder %v445_v37, 0.0  ;;  %v543_v39 = vmul.f32 0.2, %v445_v37 }
  0xae   : > { %v582_v58 = vsel %vm518_vm7, %v463_v40, %v550_v50  ;;  %v590_v59 = vsel %vm526_vm8, %v483_v41, %v558_v51 }
  0xaf   : > { %v567_v44 = vsel %vm503_vm5, %v425_v36, %v535_v38  ;;  %v575_v45 = vsel %vm511_vm6, %v445_v37, %v543_v39 }
  0xb0   : > { %v908_v46 = vpack.c.bf16 %v567_v44, %v566_v42  ;;  %v928_v47 = vpack.c.bf16 %v575_v45, %v574_v43 }
  0xb1   : > { %v464_v48 = vpop.f32.mrf.mxu2  ;;  %v484_v49 = vpop.f32.mrf.mxu3 }
  0xb2   : > { %909 = vst [vmem:[%s1290_s26] sm:$0xff] %v908_v46   ;;  %v465_v52 = vadd.f32 %v1279_v27, %v464_v48  ;;  %v485_v53 = vadd.f32 %v1279_v27, %v484_v49  ;;  %v427_v54 = vpop.f32.mrf.mxu0  ;;  %v447_v55 = vpop.f32.mrf.mxu1 }
  0xb3   : > { %988 = vst [vmem:[%s1290_s26 + $0x20] sm:$0xff] %v928_v47   ;;  %v428_v0 = vadd.f32 %v1279_v27, %v427_v54  ;;  %v448_v1 = vadd.f32 %v1279_v27, %v447_v55 }
  0xb4   : > { %vm519_vm9 = vcmp.ge.f32.partialorder %v465_v52, 0.0  ;;  %v551_v56 = vmul.f32 0.2, %v465_v52  ;;  %vm527_vm10 = vcmp.ge.f32.partialorder %v485_v53, 0.0  ;;  %v559_v57 = vmul.f32 0.2, %v485_v53 }
  0xb5   : > { %v536_v6 = vmul.f32 0.2, %v428_v0  ;;  %v544_v7 = vmul.f32 0.2, %v448_v1  ;;  %vm504_vm11 = vcmp.ge.f32.partialorder %v428_v0, 0.0  ;;  %vm512_vm12 = vcmp.ge.f32.partialorder %v448_v1, 0.0 }
  0xb6   : > { %v583_v60 = vsel %vm519_vm9, %v465_v52, %v551_v56  ;;  %v591_v61 = vsel %vm527_vm10, %v485_v53, %v559_v57 }
  0xb7   : > { %v948_v62 = vpack.c.bf16 %v583_v60, %v582_v58  ;;  %v968_v63 = vpack.c.bf16 %v591_v61, %v590_v59  ;;  %v568_v14 = vsel %vm504_vm11, %v428_v0, %v536_v6  ;;  %v576_v15 = vsel %vm512_vm12, %v448_v1, %v544_v7 }
  0xb9   : > { %992 = vst [vmem:[%s1290_s26 + $0x40] sm:$0xff] %v948_v62   ;;  %v467_v2 = vpop.f32.mrf.mxu2  ;;  %v487_v3 = vpop.f32.mrf.mxu3 }
  0xba   : > { %996 = vst [vmem:[%s1290_s26 + $0x60] sm:$0xff] %v968_v63   ;;  %v429_v4 = vpop.f32.mrf.mxu0  ;;  %v449_v5 = vpop.f32.mrf.mxu1  ;;  %v468_v12 = vadd.f32 %v1279_v27, %v467_v2  ;;  %v488_v13 = vadd.f32 %v1279_v27, %v487_v3 }
  0xbb   : > { %v430_v8 = vadd.f32 %v1279_v27, %v429_v4  ;;  %v450_v9 = vadd.f32 %v1279_v27, %v449_v5 }
  0xbc   : > { %v552_v22 = vmul.f32 0.2, %v468_v12  ;;  %v560_v23 = vmul.f32 0.2, %v488_v13  ;;  %vm520_vm15 = vcmp.ge.f32.partialorder %v468_v12, 0.0  ;;  %vm528_vm0 = vcmp.ge.f32.partialorder %v488_v13, 0.0 }
  0xbd   : > { %vm505_vm13 = vcmp.ge.f32.partialorder %v430_v8, 0.0  ;;  %v537_v10 = vmul.f32 0.2, %v430_v8  ;;  %vm513_vm14 = vcmp.ge.f32.partialorder %v450_v9, 0.0  ;;  %v545_v11 = vmul.f32 0.2, %v450_v9 }
  0xbe   : > { %v584_v31 = vsel %vm520_vm15, %v468_v12, %v552_v22  ;;  %v592_v32 = vsel %vm528_vm0, %v488_v13, %v560_v23 }
  0xbf   : > { %v569_v16 = vsel %vm505_vm13, %v430_v8, %v537_v10  ;;  %v577_v17 = vsel %vm513_vm14, %v450_v9, %v545_v11 }
  0xc0   : > { %v913_v18 = vpack.c.bf16 %v569_v16, %v568_v14  ;;  %v933_v19 = vpack.c.bf16 %v577_v17, %v576_v15 }
  0xc1   : > { %v469_v20 = vpop.f32.mrf.mxu2  ;;  %v489_v21 = vpop.f32.mrf.mxu3 }
  0xc2   : > { %985 = vst [vmem:[%s1290_s26 + $0x8] sm:$0xff] %v913_v18   ;;  %v470_v24 = vadd.f32 %v1279_v27, %v469_v20  ;;  %v490_v25 = vadd.f32 %v1279_v27, %v489_v21  ;;  %v432_v26 = vpop.f32.mrf.mxu0  ;;  %v452_v28 = vpop.f32.mrf.mxu1 }
  0xc3   : > { %989 = vst [vmem:[%s1290_s26 + $0x28] sm:$0xff] %v933_v19   ;;  %v433_v37 = vadd.f32 %v1279_v27, %v432_v26  ;;  %v453_v38 = vadd.f32 %v1279_v27, %v452_v28 }
  0xc4   : > { %vm521_vm1 = vcmp.ge.f32.partialorder %v470_v24, 0.0  ;;  %v553_v29 = vmul.f32 0.2, %v470_v24  ;;  %vm529_vm2 = vcmp.ge.f32.partialorder %v490_v25, 0.0  ;;  %v561_v30 = vmul.f32 0.2, %v490_v25 }
  0xc5   : > { %v538_v43 = vmul.f32 0.2, %v433_v37  ;;  %v546_v44 = vmul.f32 0.2, %v453_v38  ;;  %vm506_vm3 = vcmp.ge.f32.partialorder %v433_v37, 0.0  ;;  %vm514_vm4 = vcmp.ge.f32.partialorder %v453_v38, 0.0 }
  0xc6   : > { %v585_v33 = vsel %vm521_vm1, %v470_v24, %v553_v29  ;;  %v593_v34 = vsel %vm529_vm2, %v490_v25, %v561_v30 }
  0xc7   : > { %v953_v35 = vpack.c.bf16 %v585_v33, %v584_v31  ;;  %v973_v36 = vpack.c.bf16 %v593_v34, %v592_v32  ;;  %v570_v51 = vsel %vm506_vm3, %v433_v37, %v538_v43  ;;  %v578_v52 = vsel %vm514_vm4, %v453_v38, %v546_v44 }
  0xc9   : > { %993 = vst [vmem:[%s1290_s26 + $0x48] sm:$0xff] %v953_v35   ;;  %v472_v39 = vpop.f32.mrf.mxu2  ;;  %v492_v40 = vpop.f32.mrf.mxu3 }
  0xca   : > { %997 = vst [vmem:[%s1290_s26 + $0x68] sm:$0xff] %v973_v36   ;;  %v434_v41 = vpop.f32.mrf.mxu0  ;;  %v454_v42 = vpop.f32.mrf.mxu1  ;;  %v473_v49 = vadd.f32 %v1279_v27, %v472_v39  ;;  %v493_v50 = vadd.f32 %v1279_v27, %v492_v40 }
  0xcb   : > { %v435_v45 = vadd.f32 %v1279_v27, %v434_v41  ;;  %v455_v46 = vadd.f32 %v1279_v27, %v454_v42 }
  0xcc   : > { %v554_v59 = vmul.f32 0.2, %v473_v49  ;;  %v562_v60 = vmul.f32 0.2, %v493_v50  ;;  %vm522_vm7 = vcmp.ge.f32.partialorder %v473_v49, 0.0  ;;  %vm530_vm8 = vcmp.ge.f32.partialorder %v493_v50, 0.0 }
  0xcd   : > { %vm507_vm5 = vcmp.ge.f32.partialorder %v435_v45, 0.0  ;;  %v539_v47 = vmul.f32 0.2, %v435_v45  ;;  %vm515_vm6 = vcmp.ge.f32.partialorder %v455_v46, 0.0  ;;  %v547_v48 = vmul.f32 0.2, %v455_v46 }
  0xce   : > { %v586_v3 = vsel %vm522_vm7, %v473_v49, %v554_v59  ;;  %v594_v4 = vsel %vm530_vm8, %v493_v50, %v562_v60 }
  0xcf   : > { %v571_v53 = vsel %vm507_vm5, %v435_v45, %v539_v47  ;;  %v579_v54 = vsel %vm515_vm6, %v455_v46, %v547_v48 }
  0xd0   : > { %v918_v55 = vpack.c.bf16 %v571_v53, %v570_v51  ;;  %v938_v56 = vpack.c.bf16 %v579_v54, %v578_v52 }
  0xd1   : > { %v474_v57 = vpop.f32.mrf.mxu2  ;;  %v494_v58 = vpop.f32.mrf.mxu3 }
  0xd2   : > { %986 = vst [vmem:[%s1290_s26 + $0x10] sm:$0xff] %v918_v55   ;;  %v475_v61 = vadd.f32 %v1279_v27, %v474_v57  ;;  %v495_v62 = vadd.f32 %v1279_v27, %v494_v58  ;;  %v437_v63 = vpop.f32.mrf.mxu0  ;;  %v457_v0 = vpop.f32.mrf.mxu1 }
  0xd3   : > { %990 = vst [vmem:[%s1290_s26 + $0x30] sm:$0xff] %v938_v56   ;;  %v438_v9 = vadd.f32 %v1279_v27, %v437_v63  ;;  %v458_v10 = vadd.f32 %v1279_v27, %v457_v0 }
  0xd4   : > { %vm523_vm9 = vcmp.ge.f32.partialorder %v475_v61, 0.0  ;;  %v555_v1 = vmul.f32 0.2, %v475_v61  ;;  %vm531_vm10 = vcmp.ge.f32.partialorder %v495_v62, 0.0  ;;  %v563_v2 = vmul.f32 0.2, %v495_v62 }
  0xd5   : > { %v540_v15 = vmul.f32 0.2, %v438_v9  ;;  %v548_v16 = vmul.f32 0.2, %v458_v10  ;;  %vm508_vm11 = vcmp.ge.f32.partialorder %v438_v9, 0.0  ;;  %vm516_vm12 = vcmp.ge.f32.partialorder %v458_v10, 0.0 }
  0xd6   : > { %v587_v5 = vsel %vm523_vm9, %v475_v61, %v555_v1  ;;  %v595_v6 = vsel %vm531_vm10, %v495_v62, %v563_v2 }
  0xd7   : > { %v958_v7 = vpack.c.bf16 %v587_v5, %v586_v3  ;;  %v978_v8 = vpack.c.bf16 %v595_v6, %v594_v4  ;;  %v572_v23 = vsel %vm508_vm11, %v438_v9, %v540_v15  ;;  %v580_v24 = vsel %vm516_vm12, %v458_v10, %v548_v16 }
  0xd9   : > { %994 = vst [vmem:[%s1290_s26 + $0x50] sm:$0xff] %v958_v7   ;;  %v477_v11 = vpop.f32.mrf.mxu2  ;;  %v497_v12 = vpop.f32.mrf.mxu3 }
  0xda   : > { %998 = vst [vmem:[%s1290_s26 + $0x70] sm:$0xff] %v978_v8   ;;  %v439_v13 = vpop.f32.mrf.mxu0  ;;  %v459_v14 = vpop.f32.mrf.mxu1  ;;  %v478_v21 = vadd.f32 %v1279_v27, %v477_v11  ;;  %v498_v22 = vadd.f32 %v1279_v27, %v497_v12 }
  0xdb   : > { %v440_v17 = vadd.f32 %v1279_v27, %v439_v13  ;;  %v460_v18 = vadd.f32 %v1279_v27, %v459_v14 }
  0xdc   : > { %v556_v32 = vmul.f32 0.2, %v478_v21  ;;  %v564_v33 = vmul.f32 0.2, %v498_v22  ;;  %vm524_vm15 = vcmp.ge.f32.partialorder %v478_v21, 0.0  ;;  %vm532_vm0 = vcmp.ge.f32.partialorder %v498_v22, 0.0 }
  0xdd   : > { %vm509_vm13 = vcmp.ge.f32.partialorder %v440_v17, 0.0  ;;  %v541_v19 = vmul.f32 0.2, %v440_v17  ;;  %vm517_vm14 = vcmp.ge.f32.partialorder %v460_v18, 0.0  ;;  %v549_v20 = vmul.f32 0.2, %v460_v18 }
  0xde   : > { %v588_v38 = vsel %vm524_vm15, %v478_v21, %v556_v32  ;;  %v596_v39 = vsel %vm532_vm0, %v498_v22, %v564_v33 }
  0xdf   : > { %v573_v25 = vsel %vm509_vm13, %v440_v17, %v541_v19  ;;  %v581_v26 = vsel %vm517_vm14, %v460_v18, %v549_v20 }
  0xe0   : > { %v923_v28 = vpack.c.bf16 %v573_v25, %v572_v23  ;;  %v943_v29 = vpack.c.bf16 %v581_v26, %v580_v24 }
  0xe1   : > { %v479_v30 = vpop.f32.mrf.mxu2  ;;  %v499_v31 = vpop.f32.mrf.mxu3 }
  0xe2   : > { %987 = vst [vmem:[%s1290_s26 + $0x18] sm:$0xff] %v923_v28   ;;  %v480_v34 = vadd.f32 %v1279_v27, %v479_v30  ;;  %v500_v35 = vadd.f32 %v1279_v27, %v499_v31 }
  0xe3   : > { %991 = vst [vmem:[%s1290_s26 + $0x38] sm:$0xff] %v943_v29  }
  0xe4   : > { %vm525_vm1 = vcmp.ge.f32.partialorder %v480_v34, 0.0  ;;  %v557_v36 = vmul.f32 0.2, %v480_v34  ;;  %vm533_vm2 = vcmp.ge.f32.partialorder %v500_v35, 0.0  ;;  %v565_v37 = vmul.f32 0.2, %v500_v35 }
  0xe6   : > { %v589_v40 = vsel %vm525_vm1, %v480_v34, %v557_v36  ;;  %v597_v41 = vsel %vm533_vm2, %v500_v35, %v565_v37 }
  0xe7   : > { %v963_v42 = vpack.c.bf16 %v589_v40, %v588_v38  ;;  %v983_v43 = vpack.c.bf16 %v597_v41, %v596_v39 }
  0xe9   : > { %995 = vst [vmem:[%s1290_s26 + $0x58] sm:$0xff] %v963_v42  }
  0xea   : > { %999 = vst [vmem:[%s1290_s26 + $0x78] sm:$0xff] %v983_v43  }
  0xeb   : > { %1095 = shalt.err (!%p1092_p5)
}
  0xec   : > { %s1149_s19 = smov 64   ;;  %s1150_s21 = smov 4  }
  0xed   : > { %1009 = dma.vmem_to_hbm [thread:$0]  (%p1211_p4), %s677_s30, 2048, %s679_s4, %s663_s5, %s1149_s19, %s1149_s19, %s1150_s21  }
  0xee PF: > { %p1015_p6 = scmp.ge.s32.totalorder %s1146_s17, 2  ;;  %s693_s23 = sand.u32 1, %s1126_s12  }
  0xef   : > { %s694_s26 = scalar_lea.sflag [#allocation3], %s693_s23 }
  0xf0   : > { %p1012_p7 = pnand %p1015_p6, %p1218_p8 }
  0xf2   : > { %p1013_p9 = pneg %p1012_p7 }
  0xf4   : > { %1121 = dma.done.wait (%p1013_p9), %s694_s26, 2048  }
  0xf5   : > { %1123 = vsyncadd (%p1013_p9), %s694_s26, 4294965248  ;;  %s16_s17 = sadd.s32 1, %s1146_s17   ;;  %s1379_s12 = smov %s1130_s13 }
  0xf6   : > { %p13_p10 = scmp.ge.s32.totalorder %s16_s17, 6   ;;  %s1380_s13 = smov %s1134_s14 }
  0xf7   : > { %s1381_s14 = smov %s1224_s25  ;;  %s1382_s15 = smov %s1142_s16 }
  0xf8   : > { %s1383_s16 = smov %s1385_s20  ;;  %15 = sbr.rel (!%p13_p10) target bundleno = 4 (0x4), region = 73 }
  0xfd   :  { %700 = vsyncpa [#allocation3], 1 }
  0xfe   :  { %702 = vsyncpa [#allocation3 + $0x1], 1 }

</bundles_post_ra>
